<compile_context>
chip_gen: v6e
topology: v6e:2x2x1
jax: 0.10.0
libtpu: 0.0.40
codegen_flags: <defaults>
</compile_context>

<pallas_src>
import jax
import jax.numpy as jnp
from jax.experimental import pallas as pl


def _embed_kernel(x_ref, w1_ref, b1_ref, w2_ref, b2_ref, o_ref):
    # relu(x @ w1 + b1) @ w2 + b2 for ALL rows (both branches folded into M).
    x = x_ref[...].astype(jnp.bfloat16)                               # in-kernel cast
    h = jnp.dot(x, w1_ref[...], preferred_element_type=jnp.float32)   # (M, H)  f32 acc
    h = jnp.maximum(h + b1_ref[...], 0.0)                             # bias+ReLU in f32
    h = h.astype(jnp.bfloat16)                                        # bf16 for 2nd MXU pass
    o = jnp.dot(h, w2_ref[...], preferred_element_type=jnp.float32)   # (M, Ep) f32 acc
    o_ref[...] = o + b2_ref[...]


def _pad_last(a, multiple=128):
    """Zero-pad the last dim up to a multiple of `multiple` (lane-dense stores)."""
    pad = (-a.shape[-1]) % multiple
    if pad == 0:
        return a
    widths = [(0, 0)] * (a.ndim - 1) + [(0, pad)]
    return jnp.pad(a, widths)


def init_params(key, in_dim, hidden_dim, emb_dim):
    """Raw f32 parameters (weights laid out (in, out) so the kernel does x @ W + b)."""
    k1, k2 = jax.random.split(key)
    w1 = (jax.random.normal(k1, (in_dim, hidden_dim), jnp.float32)
          * (1.0 / jnp.sqrt(in_dim)))
    b1 = jnp.zeros((1, hidden_dim), jnp.float32)
    w2 = (jax.random.normal(k2, (hidden_dim, emb_dim), jnp.float32)
          * (1.0 / jnp.sqrt(hidden_dim)))
    b2 = jnp.zeros((1, emb_dim), jnp.float32)
    return (w1, b1, w2, b2)


def prepare_params(params):
    """One-time weight prep: bf16 quantization + 128-lane padding.

    Do this ONCE and reuse the result — the forward path performs no per-call
    weight casts or pads.
    """
    w1, b1, w2, b2 = params
    w1b = w1.astype(jnp.bfloat16)                 # (D, H)   bf16 MXU operand
    b1f = b1.astype(jnp.float32)                  # (1, H)   f32 bias
    w2p = _pad_last(w2).astype(jnp.bfloat16)      # (H, Ep)  lane-padded bf16
    b2p = _pad_last(b2.astype(jnp.float32))       # (1, Ep)  lane-padded f32
    return (w1b, b1f, w2p, b2p)


def _embed_rows(x2d, prepared):
    """Embed a (M, D) f32 slab of flattened inputs -> (M, Ep) f32 (lane-padded)."""
    w1b, b1f, w2p, b2p = prepared
    M, D = x2d.shape
    Hd = w1b.shape[1]
    Ep = w2p.shape[1]

    flops = 2 * M * D * Hd + 2 * M * Hd * Ep
    bytes_accessed = (x2d.size * 4 + w1b.size * 2 + w2p.size * 2
                      + b1f.size * 4 + b2p.size * 4 + M * Ep * 4)

    # Single grid-less step: every operand fits in one VMEM block, weights are
    # DMA'd exactly once, and there is no per-branch grid iteration.
    # TODO(synk): for real image sizes (large D) or large M, add a "parallel"
    # M axis plus an innermost "arbitrary" K axis with an f32 accumulator, pin
    # the weight BlockSpecs with pipeline_mode=pl.Buffered(1) (single-buffer),
    # and size tiles against v7x's 64 MiB physical / 32 MiB scoped VMEM.
    return pl.pallas_call(
        _embed_kernel,
        out_shape=jax.ShapeDtypeStruct((M, Ep), jnp.float32),
        in_specs=[
            pl.BlockSpec((M, D), lambda: (0, 0)),    # activations (both branches)
            pl.BlockSpec((D, Hd), lambda: (0, 0)),   # shared weights: one DMA total
            pl.BlockSpec((1, Hd), lambda: (0, 0)),
            pl.BlockSpec((Hd, Ep), lambda: (0, 0)),
            pl.BlockSpec((1, Ep), lambda: (0, 0)),
        ],
        out_specs=pl.BlockSpec((M, Ep), lambda: (0, 0)),
        cost_estimate=pl.CostEstimate(
            flops=flops, transcendentals=0, bytes_accessed=bytes_accessed),
    )(x2d, w1b, b1f, w2p, b2p)


def siamese_net(x1, x2, prepared, *, emb_dim):
    """SiameseNet.forward: both shared-weight branches in ONE kernel launch."""
    b1 = x1.shape[0]
    b2 = x2.shape[0]
    # Fold the two branches into the matmul M dimension (row-major flatten,
    # same as torch .view(B, -1)); x stays f32, cast happens in-kernel.
    x = jnp.concatenate([x1.reshape(b1, -1), x2.reshape(b2, -1)], axis=0)
    out = _embed_rows(x.astype(jnp.float32), prepared)[:, :emb_dim]
    return out[:b1], out[b1:]


def get_embedding(x, prepared, *, emb_dim):
    """SiameseNet.get_embedding."""
    out = _embed_rows(x.reshape(x.shape[0], -1).astype(jnp.float32), prepared)
    return out[:, :emb_dim]


def _reference(x1, x2, params):
    """Pure-JAX reference with the same bf16 operand quantization (f32 math)."""
    w1, b1, w2, b2 = params
    w1q = w1.astype(jnp.bfloat16).astype(jnp.float32)
    w2q = w2.astype(jnp.bfloat16).astype(jnp.float32)

    def emb(x):
        xf = x.reshape(x.shape[0], -1).astype(jnp.bfloat16).astype(jnp.float32)
        h = jnp.maximum(xf @ w1q + b1, 0.0)
        h = h.astype(jnp.bfloat16).astype(jnp.float32)
        return h @ w2q + b2

    return emb(x1), emb(x2)


if __name__ == "__main__":
    # Small shapes: batch=2, channels=4, spatial=16x16 -> D=1024, hidden=128, emb=64
    B, C, H, W = 2, 4, 16, 16
    HID, EMB = 128, 64

    key = jax.random.PRNGKey(0)
    kx1, kx2, kp = jax.random.split(key, 3)
    x1 = jax.random.normal(kx1, (B, C, H, W), jnp.float32)
    x2 = jax.random.normal(kx2, (B, C, H, W), jnp.float32)

    params = init_params(kp, C * H * W, HID, EMB)
    prepared = prepare_params(params)          # one-time weight quantize + pad

    fwd = jax.jit(siamese_net, static_argnames=("emb_dim",))
    emb_fn = jax.jit(get_embedding, static_argnames=("emb_dim",))

    out1, out2 = fwd(x1, x2, prepared, emb_dim=EMB)
    out1 = jax.block_until_ready(out1)
    out2 = jax.block_until_ready(out2)
    emb1 = jax.block_until_ready(emb_fn(x1, prepared, emb_dim=EMB))

    # sanity check against a pure-JAX reference (same bf16 quantization)
    ref1, ref2 = _reference(x1, x2, params)
    assert out1.shape == (B, EMB) and out2.shape == (B, EMB)
    assert emb1.shape == (B, EMB)
    assert jnp.allclose(out1, ref1, atol=1e-2, rtol=1e-2)
    assert jnp.allclose(out2, ref2, atol=1e-2, rtol=1e-2)
    assert jnp.allclose(emb1, ref1, atol=1e-2, rtol=1e-2)

    print("KERNEL_OK")
</pallas_src>

<mosaic_0001>
module attributes {stable_mosaic.version = 11 : i64} {
  func.func @_embed_kernel(%arg0: memref<4x1024xf32, #tpu.memory_space<vmem>>, %arg1: memref<1024x128xbf16, #tpu.memory_space<vmem>>, %arg2: memref<1x128xf32, #tpu.memory_space<vmem>>, %arg3: memref<128x128xbf16, #tpu.memory_space<vmem>>, %arg4: memref<1x128xf32, #tpu.memory_space<vmem>>, %arg5: memref<4x128xf32, #tpu.memory_space<vmem>>) attributes {dimension_semantics = [], scalar_prefetch = 0 : i64, scratch_operands = 0 : i64, tpu.core_type = #tpu.core_type<tc>} {
    %c0 = arith.constant 0 : index
    %c0_0 = arith.constant 0 : index
    %0 = vector.load %arg0[%c0, %c0_0] : memref<4x1024xf32, #tpu.memory_space<vmem>>, vector<4x1024xf32>
    %1 = arith.truncf %0 : vector<4x1024xf32> to vector<4x1024xbf16>
    %c0_1 = arith.constant 0 : index
    %c0_2 = arith.constant 0 : index
    %2 = vector.load %arg1[%c0_1, %c0_2] : memref<1024x128xbf16, #tpu.memory_space<vmem>>, vector<1024x128xbf16>
    %cst = arith.constant dense<0.000000e+00> : vector<4x128xf32>
    %3 = tpu.matmul %1, %2, %cst {dimension_numbers = #tpu.dot_dimension_numbers<[1], [0], [0], [1], [0, 0, 1, 1], [], []>} : vector<4x1024xbf16>, vector<1024x128xbf16>, vector<4x128xf32> -> vector<4x128xf32>
    %c0_3 = arith.constant 0 : index
    %c0_4 = arith.constant 0 : index
    %4 = vector.load %arg2[%c0_3, %c0_4] : memref<1x128xf32, #tpu.memory_space<vmem>>, vector<1x128xf32>
    %5 = vector.broadcast %4 : vector<1x128xf32> to vector<4x128xf32>
    %6 = arith.addf %3, %5 : vector<4x128xf32>
    %cst_5 = arith.constant 0.000000e+00 : f32
    %7 = vector.broadcast %cst_5 : f32 to vector<4x128xf32>
    %8 = arith.maximumf %6, %7 : vector<4x128xf32>
    %9 = arith.truncf %8 : vector<4x128xf32> to vector<4x128xbf16>
    %c0_6 = arith.constant 0 : index
    %c0_7 = arith.constant 0 : index
    %10 = vector.load %arg3[%c0_6, %c0_7] : memref<128x128xbf16, #tpu.memory_space<vmem>>, vector<128x128xbf16>
    %cst_8 = arith.constant dense<0.000000e+00> : vector<4x128xf32>
    %11 = tpu.matmul %9, %10, %cst_8 {dimension_numbers = #tpu.dot_dimension_numbers<[1], [0], [0], [1], [0, 0, 1, 1], [], []>} : vector<4x128xbf16>, vector<128x128xbf16>, vector<4x128xf32> -> vector<4x128xf32>
    %c0_9 = arith.constant 0 : index
    %c0_10 = arith.constant 0 : index
    %12 = vector.load %arg4[%c0_9, %c0_10] : memref<1x128xf32, #tpu.memory_space<vmem>>, vector<1x128xf32>
    %13 = vector.broadcast %12 : vector<1x128xf32> to vector<4x128xf32>
    %14 = arith.addf %11, %13 : vector<4x128xf32>
    %c0_11 = arith.constant 0 : index
    %c0_12 = arith.constant 0 : index
    %15 = vector.load %arg5[%c0_11, %c0_12] : memref<4x128xf32, #tpu.memory_space<vmem>>, vector<4x128xf32>
    tpu.vector_store %arg5[%c0_11, %c0_12], %14 {strides = array<i32>} : memref<4x128xf32, #tpu.memory_space<vmem>>, vector<4x128xf32>,
    return
  }
}

</mosaic_0001>

<bundles_post_ra>
// kernel: siamese_net.1
= control target key start
LH: loop header
LB: loop body
LE: loop exit
PB: predicated region body
PF: predicated region fallthrough
CT: control target
= control target key end

     0   :  { %10 = vsyncpa [#allocation3], 0  ;;  %s1151_s18 = smov [#allocation2]   ;;  %s1234_s0 = inlined_call_operand.vmem [shape: f32[4,1024], index: 0, kind: input, shape index: {}]   ;;  %s1235_s1 = inlined_call_operand.hbm [shape: bf16[1024,128], index: 1, kind: input, shape index: {}]   ;;  %s1236_s2 = inlined_call_operand.vmem [shape: f32[1,128], index: 2, kind: input, shape index: {}]   ;;  %s1237_s3 = inlined_call_operand.vmem [shape: bf16[128,128], index: 3, kind: input, shape index: {}]   ;;  %s1238_s4 = inlined_call_operand.vmem [shape: f32[1,128], index: 4, kind: input, shape index: {}]   ;;  %s1239_s5 = inlined_call_operand.vmem [shape: f32[4,128], index: 5, kind: output, shape index: {}]  }
   0x1   :  { %s18_s19 = sshll.u32 %s1151_s18, 4  ;;  %s19_s19 = int_to_ptr.vmem [resolvable:$true] %s18_s19 }
   0x2   :  { %s1137_s20 = scalar_lea.vmem %s19_s19, 8192  ;;  %p1142_p1 = scmp.lt.s32.totalorder %s19_s19, %s19_s19 }
   0x3   :  { %p1138_p0 = scmp.ne.s32.totalorder %s19_s19, %s1137_s20  ;;  %p1143_p2 = scmp.lt.s32.totalorder %s1137_s20, %s1137_s20 }
   0x5   :  { %p1144_p3 = por %p1143_p2, %p1142_p1 }
   0x7   :  { %p1145_p4 = pnand %p1144_p3, %p1138_p0 }
   0x9   :  { %1148 = shalt.err (!%p1145_p4)
}
   0xa   :  { %s1152_s21 = smov 64   ;;  %s1153_s22 = smov 4  }
   0xb   :  { %24 = dma.hbm_to_vmem [thread:$0]  %s1235_s1, 8192, %s19_s19, [#allocation3], %s1152_s21, %s1152_s21, %s1153_s22  }
   0xc   :  { %1149 = dma.done.wait [#allocation3], 8192  }
   0xd   :  { %1150 = vsyncadd [#allocation3], 4294959104  ;;  %v1053_v0 = vld [vmem:[#allocation2 + $0x78] sm:$0xff]   ;;  %v1057_v4 = vld [vmem:[#allocation2 + $0x70] sm:$0xff]   ;;  %vm1155_vm0 = vmmov 0  }
   0xe   :  { %v1054_v1 = vld [vmem:[#allocation2 + $0xf8] sm:$0xff]   ;;  %931 = vmatprep.subr.bf16.mxu0 %v1053_v0  ;;  %v1058_v5 = vld [vmem:[#allocation2 + $0xf0] sm:$0xff]   ;;  %v1061_v8 = vld [vmem:[#allocation2 + $0x68] sm:$0xff]  }
   0xf   :  { %v1055_v2 = vld [vmem:[#allocation2 + $0x38] sm:$0xff]   ;;  %953 = vmatprep.subr.bf16.mxu1 %v1054_v1  ;;  %v1059_v6 = vld [vmem:[#allocation2 + $0x30] sm:$0xff]   ;;  %v1062_v9 = vld [vmem:[#allocation2 + $0xe8] sm:$0xff]  }
  0x10   :  { %v1056_v3 = vld [vmem:[#allocation2 + $0xb8] sm:$0xff]   ;;  %932 = vmatpush3.bf16.msra.mxu0 %v1055_v2  ;;  %v1060_v7 = vld [vmem:[#allocation2 + $0xb0] sm:$0xff]   ;;  %v1063_v10 = vld [vmem:[#allocation2 + $0x28] sm:$0xff]  }
  0x11   :  { %954 = vmatpush3.bf16.msra.mxu1 %v1056_v3  ;;  %933 = vmatprep.subr.bf16.mxu0 %v1057_v4  ;;  %v1064_v11 = vld [vmem:[#allocation2 + $0xa8] sm:$0xff]   ;;  %v1065_v12 = vld [vmem:[#allocation2 + $0x60] sm:$0xff]   ;;  %v1069_v16 = vld [vmem:[#allocation2 + $0x58] sm:$0xff]  }
  0x12   :  { %955 = vmatprep.subr.bf16.mxu1 %v1058_v5  ;;  %v1066_v13 = vld [vmem:[#allocation2 + $0xe0] sm:$0xff]   ;;  %v1070_v17 = vld [vmem:[#allocation2 + $0xd8] sm:$0xff]   ;;  %v1073_v20 = vld [vmem:[#allocation2 + $0x50] sm:$0xff]  }
  0x13   :  { %v1067_v14 = vld [vmem:[#allocation2 + $0x20] sm:$0xff]   ;;  %v1071_v18 = vld [vmem:[#allocation2 + $0x18] sm:$0xff]   ;;  %v1074_v21 = vld [vmem:[#allocation2 + $0xd0] sm:$0xff]  }
  0x14   :  { %934 = vmatpush3.bf16.msra.mxu0 %v1059_v6  ;;  %v1068_v15 = vld [vmem:[#allocation2 + $0xa0] sm:$0xff]   ;;  %v1072_v19 = vld [vmem:[#allocation2 + $0x98] sm:$0xff]   ;;  %v1075_v22 = vld [vmem:[#allocation2 + $0x10] sm:$0xff]  }
  0x15   :  { %956 = vmatpush3.bf16.msra.mxu1 %v1060_v7  ;;  %935 = vmatprep.subr.bf16.mxu0 %v1061_v8  ;;  %v1076_v23 = vld [vmem:[#allocation2 + $0x90] sm:$0xff]   ;;  %v1077_v24 = vld [vmem:[#allocation2 + $0x48] sm:$0xff]   ;;  %v1081_v28 = vld [vmem:[#allocation2 + $0x40] sm:$0xff]  }
  0x16   :  { %957 = vmatprep.subr.bf16.mxu1 %v1062_v9  ;;  %v1078_v25 = vld [vmem:[#allocation2 + $0xc8] sm:$0xff]   ;;  %v1082_v29 = vld [vmem:[#allocation2 + $0xc0] sm:$0xff]   ;;  %v1087_v36 = vld [vmem:[#allocation2 + $0x178] sm:$0xff]  }
  0x17   :  { %v1079_v26 = vld [vmem:[#allocation2 + $0x8] sm:$0xff]   ;;  %v1083_v30 = vld [vmem:[#allocation2] sm:$0xff]   ;;  %v1088_v39 = vld [vmem:[#allocation2 + $0x1f8] sm:$0xff]  }
  0x18   :  { %936 = vmatpush3.bf16.msra.mxu0 %v1063_v10  ;;  %v1080_v27 = vld [vmem:[#allocation2 + $0x88] sm:$0xff]   ;;  %v1084_v31 = vld [vmem:[#allocation2 + $0x80] sm:$0xff]   ;;  %v1089_v42 = vld [vmem:[#allocation2 + $0x138] sm:$0xff]  }
  0x19   :  { %958 = vmatpush3.bf16.msra.mxu1 %v1064_v11  ;;  %937 = vmatprep.subr.bf16.mxu0 %v1065_v12  ;;  %v35_v32 = vld [vmem:[%s1234_s0] sm:$0xff]  ;;  %v36_v33 = vld [vmem:[%s1234_s0 + $0x8] sm:$0xff]  ;;  %v1090_v43 = vld [vmem:[#allocation2 + $0x1b8] sm:$0xff]  }
  0x1a   :  { %959 = vmatprep.subr.bf16.mxu1 %v1066_v13  ;;  %v43_v34 = vcombine.high %v35_v32, %v35_v32  ;;  %v44_v35 = vcombine.high %v36_v33, %v36_v33  ;;  %v51_v37 = vpack.c.bf16 %v35_v32, %v35_v32  ;;  %v53_v38 = vpack.c.bf16 %v36_v33, %v36_v33  ;;  %v1091_v44 = vld [vmem:[#allocation2 + $0x170] sm:$0xff]   ;;  %v1095_v48 = vld [vmem:[#allocation2 + $0x168] sm:$0xff]   ;;  %v1099_v52 = vld [vmem:[#allocation2 + $0x160] sm:$0xff]  }
  0x1b   :  { %v1092_v45 = vld [vmem:[#allocation2 + $0x1f0] sm:$0xff]   ;;  %v1096_v49 = vld [vmem:[#allocation2 + $0x1e8] sm:$0xff]   ;;  %v1100_v53 = vld [vmem:[#allocation2 + $0x1e0] sm:$0xff]  }
  0x1c   :  { %938 = vmatpush3.bf16.msra.mxu0 %v1067_v14  ;;  %v52_v40 = vpack.c.bf16 %v43_v34, %v43_v34  ;;  %v54_v41 = vpack.c.bf16 %v44_v35, %v44_v35  ;;  %v1093_v46 = vld [vmem:[#allocation2 + $0x130] sm:$0xff]   ;;  %v1097_v50 = vld [vmem:[#allocation2 + $0x128] sm:$0xff]   ;;  %v1101_v54 = vld [vmem:[#allocation2 + $0x120] sm:$0xff]  }
  0x1d   :  { %960 = vmatpush3.bf16.msra.mxu1 %v1068_v15  ;;  %939 = vmatprep.subr.bf16.mxu0 %v1069_v16  ;;  %v1094_v47 = vld [vmem:[#allocation2 + $0x1b0] sm:$0xff]   ;;  %v1098_v51 = vld [vmem:[#allocation2 + $0x1a8] sm:$0xff]   ;;  %v1102_v55 = vld [vmem:[#allocation2 + $0x1a0] sm:$0xff]  }
  0x1e   :  { %961 = vmatprep.subr.bf16.mxu1 %v1070_v17  ;;  %610 = vmatprep.mubr.bf16.mxu0 %v52_v40  ;;  %v1103_v56 = vld [vmem:[#allocation2 + $0x158] sm:$0xff]   ;;  %v1107_v60 = vld [vmem:[#allocation2 + $0x150] sm:$0xff]   ;;  %v1111_v0 = vld [vmem:[#allocation2 + $0x148] sm:$0xff]   ;;  %v1154_v17 = vmov 0.0  }
  0x1f   :  { %650 = vmatprep.mubr.bf16.mxu1 %v54_v41  ;;  %v1104_v57 = vld [vmem:[#allocation2 + $0x1d8] sm:$0xff]   ;;  %v1108_v61 = vld [vmem:[#allocation2 + $0x1d0] sm:$0xff]   ;;  %v1112_v1 = vld [vmem:[#allocation2 + $0x1c8] sm:$0xff]  }
  0x20   :  { %940 = vmatpush3.bf16.msra.mxu0 %v1071_v18  ;;  %v1105_v58 = vld [vmem:[#allocation2 + $0x118] sm:$0xff]   ;;  %v1109_v62 = vld [vmem:[#allocation2 + $0x110] sm:$0xff]   ;;  %v1113_v2 = vld [vmem:[#allocation2 + $0x108] sm:$0xff]  }
  0x21   :  { %962 = vmatpush3.bf16.msra.mxu1 %v1072_v19  ;;  %941 = vmatprep.subr.bf16.mxu0 %v1073_v20  ;;  %v1106_v59 = vld [vmem:[#allocation2 + $0x198] sm:$0xff]   ;;  %v1110_v63 = vld [vmem:[#allocation2 + $0x190] sm:$0xff]   ;;  %v1114_v3 = vld [vmem:[#allocation2 + $0x188] sm:$0xff]  }
  0x22   :  { %963 = vmatprep.subr.bf16.mxu1 %v1074_v21  ;;  %v1115_v4 = vld [vmem:[#allocation2 + $0x140] sm:$0xff]   ;;  %v37_v8 = vld [vmem:[%s1234_s0 + $0x10] sm:$0xff]  ;;  %v38_v10 = vld [vmem:[%s1234_s0 + $0x18] sm:$0xff] }
  0x23   :  { %v1116_v5 = vld [vmem:[#allocation2 + $0x1c0] sm:$0xff]   ;;  %v45_v9 = vcombine.high %v37_v8, %v37_v8  ;;  %v55_v11 = vpack.c.bf16 %v37_v8, %v37_v8  ;;  %v46_v12 = vcombine.high %v38_v10, %v38_v10  ;;  %v57_v14 = vpack.c.bf16 %v38_v10, %v38_v10  ;;  %v1121_v16 = vld [vmem:[%s1237_s3 + $0x38] sm:$0xff]   ;;  %v1122_v18 = vld [vmem:[%s1237_s3 + $0x30] sm:$0xff]  }
  0x24   :  { %942 = vmatpush3.bf16.msra.mxu0 %v1075_v22  ;;  %v1117_v6 = vld [vmem:[#allocation2 + $0x100] sm:$0xff]   ;;  %v1123_v19 = vld [vmem:[%s1237_s3 + $0x28] sm:$0xff]   ;;  %v1125_v21 = vld [vmem:[%s1237_s3 + $0x18] sm:$0xff]  }
  0x25   :  { %964 = vmatpush3.bf16.msra.mxu1 %v1076_v23  ;;  %943 = vmatprep.subr.bf16.mxu0 %v1077_v24  ;;  %v1118_v7 = vld [vmem:[#allocation2 + $0x180] sm:$0xff]   ;;  %v56_v13 = vpack.c.bf16 %v45_v9, %v45_v9  ;;  %v58_v15 = vpack.c.bf16 %v46_v12, %v46_v12  ;;  %v1126_v22 = vld [vmem:[%s1237_s3 + $0x10] sm:$0xff]   ;;  %v1127_v23 = vld [vmem:[%s1237_s3 + $0x8] sm:$0xff]  }
  0x26   :  { %965 = vmatprep.subr.bf16.mxu1 %v1078_v25  ;;  %v1124_v20 = vld [vmem:[%s1237_s3 + $0x20] sm:$0xff]  }
  0x27   :  { %v1128_v24 = vld [vmem:[%s1237_s3] sm:$0xff]  }
  0x28   :  { %944 = vmatpush3.bf16.msra.mxu0 %v1079_v26  ;;  %v857_v34 = vld [vmem:[%s1236_s2] ss:$0 sm:$0xff] }
  0x29   :  { %966 = vmatpush3.bf16.msra.mxu1 %v1080_v27  ;;  %945 = vmatprep.subr.bf16.mxu0 %v1081_v28 }
  0x2a   :  { %967 = vmatprep.subr.bf16.mxu1 %v1082_v29 }
  0x2c   :  { %946 = vmatpush3.bf16.msra.mxu0 %v1083_v30 }
  0x2d   :  { %968 = vmatpush3.bf16.msra.mxu1 %v1084_v31  ;;  %975 = vmatprep.subr.bf16.mxu0 %v1087_v36 }
  0x2e   :  { %997 = vmatprep.subr.bf16.mxu1 %v1088_v39 }
  0x2f   :  { %611 = vmatmul.mubr.bf16.vlgmr.msra.gmra.mxu0 %v51_v37 }
  0x30   :  { %651 = vmatmul.mubr.bf16.vlgmr.msra.gmra.mxu1 %v53_v38  ;;  %976 = vmatpush3.bf16.msra.mxu0 %v1089_v42 }
  0x31   :  { %998 = vmatpush3.bf16.msra.mxu1 %v1090_v43  ;;  %977 = vmatprep.subr.bf16.mxu0 %v1091_v44 }
  0x32   :  { %999 = vmatprep.subr.bf16.mxu1 %v1092_v45  ;;  %690 = vmatprep.mubr.bf16.mxu0 %v56_v13 }
  0x33   :  { %730 = vmatprep.mubr.bf16.mxu1 %v58_v15 }
  0x34   :  { %978 = vmatpush3.bf16.msra.mxu0 %v1093_v46 }
  0x35   :  { %1000 = vmatpush3.bf16.msra.mxu1 %v1094_v47  ;;  %979 = vmatprep.subr.bf16.mxu0 %v1095_v48 }
  0x36   :  { %1001 = vmatprep.subr.bf16.mxu1 %v1096_v49 }
  0x38   :  { %980 = vmatpush3.bf16.msra.mxu0 %v1097_v50 }
  0x39   :  { %1002 = vmatpush3.bf16.msra.mxu1 %v1098_v51  ;;  %981 = vmatprep.subr.bf16.mxu0 %v1099_v52  ;;  %v922_v52 = vld [vmem:[%s1238_s4] ss:$0 sm:$0xff] }
  0x3a   :  { %1003 = vmatprep.subr.bf16.mxu1 %v1100_v53 }
  0x3c   :  { %982 = vmatpush3.bf16.msra.mxu0 %v1101_v54 }
  0x3d   :  { %1004 = vmatpush3.bf16.msra.mxu1 %v1102_v55  ;;  %983 = vmatprep.subr.bf16.mxu0 %v1103_v56 }
  0x3e   :  { %1005 = vmatprep.subr.bf16.mxu1 %v1104_v57 }
  0x40   :  { %984 = vmatpush3.bf16.msra.mxu0 %v1105_v58 }
  0x41   :  { %1006 = vmatpush3.bf16.msra.mxu1 %v1106_v59  ;;  %985 = vmatprep.subr.bf16.mxu0 %v1107_v60 }
  0x42   :  { %1007 = vmatprep.subr.bf16.mxu1 %v1108_v61 }
  0x44   :  { %986 = vmatpush3.bf16.msra.mxu0 %v1109_v62 }
  0x45   :  { %1008 = vmatpush3.bf16.msra.mxu1 %v1110_v63  ;;  %987 = vmatprep.subr.bf16.mxu0 %v1111_v0 }
  0x46   :  { %1009 = vmatprep.subr.bf16.mxu1 %v1112_v1 }
  0x48   :  { %988 = vmatpush3.bf16.msra.mxu0 %v1113_v2 }
  0x49   :  { %1010 = vmatpush3.bf16.msra.mxu1 %v1114_v3  ;;  %989 = vmatprep.subr.bf16.mxu0 %v1115_v4 }
  0x4a   :  { %1011 = vmatprep.subr.bf16.mxu1 %v1116_v5 }
  0x4c   :  { %990 = vmatpush3.bf16.msra.mxu0 %v1117_v6 }
  0x4d   :  { %1012 = vmatpush3.bf16.msra.mxu1 %v1118_v7  ;;  %1028 = vmatprep.subr.bf16.mxu0 %v1154_v17 }
  0x4f   :  { %691 = vmatmul.mubr.bf16.vlgmr.msra.gmra.mxu0 %v55_v11 }
  0x50   :  { %731 = vmatmul.mubr.bf16.vlgmr.msra.gmra.mxu1 %v57_v14  ;;  %1029 = vmatpush3.bf16.msra.mxu0 %v1121_v16 }
  0x51   :  { %1030 = vmatprep.subr.bf16.mxu0 %v1154_v17  ;;  %1044 = vmatprep.mubr.msk.bf16.mxu0 %vm1155_vm0, %v1154_v17 }
  0x54   :  { %1031 = vmatpush3.bf16.msra.mxu0 %v1122_v18 }
  0x55   :  { %1032 = vmatprep.subr.bf16.mxu0 %v1154_v17 }
  0x58   :  { %1033 = vmatpush3.bf16.msra.mxu0 %v1123_v19 }
  0x59   :  { %1034 = vmatprep.subr.bf16.mxu0 %v1154_v17 }
  0x5c   :  { %1035 = vmatpush3.bf16.msra.mxu0 %v1124_v20 }
  0x5d   :  { %1036 = vmatprep.subr.bf16.mxu0 %v1154_v17 }
  0x60   :  { %1037 = vmatpush3.bf16.msra.mxu0 %v1125_v21 }
  0x61   :  { %1038 = vmatprep.subr.bf16.mxu0 %v1154_v17 }
  0x64   :  { %1039 = vmatpush3.bf16.msra.mxu0 %v1126_v22 }
  0x65   :  { %1040 = vmatprep.subr.bf16.mxu0 %v1154_v17 }
  0x68   :  { %1041 = vmatpush3.bf16.msra.mxu0 %v1127_v23 }
  0x69   :  { %1042 = vmatprep.subr.bf16.mxu0 %v1154_v17 }
  0x6c   :  { %1043 = vmatpush3.bf16.msra.mxu0 %v1128_v24 }
  0xef   :  { %v947_v25 = vpop.f32.mrf.mxu0 }
  0xf0   :  { %v969_v26 = vpop.f32.mrf.mxu1 }
  0xf1   :  { %v948_v27 = vpop.f32.mrf.mxu0 }
  0xf2   :  { %v970_v28 = vpop.f32.mrf.mxu1  ;;  %v949_v33 = vadd.f32 %v948_v27, %v947_v25 }
  0xf3   :  { %v950_v29 = vpop.f32.mrf.mxu0  ;;  %v971_v36 = vadd.f32 %v970_v28, %v969_v26 }
  0xf4   :  { %v972_v30 = vpop.f32.mrf.mxu1  ;;  %v613_v35 = vadd.f32 %v949_v33, %v857_v34 }
  0xf5   :  { %v951_v31 = vpop.f32.mrf.mxu0 }
  0xf6   :  { %v973_v32 = vpop.f32.mrf.mxu1  ;;  %v653_v40 = vadd.f32 %v971_v36, %v613_v35 }
 0x10f   :  { %v991_v37 = vpop.f32.mrf.mxu0 }
 0x110   :  { %v1013_v38 = vpop.f32.mrf.mxu1 }
 0x111   :  { %v992_v39 = vpop.f32.mrf.mxu0 }
 0x112   :  { %v993_v41 = vadd.f32 %v992_v39, %v991_v37  ;;  %v1014_v42 = vpop.f32.mrf.mxu1 }
 0x113   :  { %v994_v43 = vpop.f32.mrf.mxu0  ;;  %v1015_v45 = vadd.f32 %v1014_v42, %v1013_v38 }
 0x114   :  { %v693_v44 = vadd.f32 %v993_v41, %v653_v40  ;;  %v1016_v46 = vpop.f32.mrf.mxu1 }
 0x115   :  { %v995_v47 = vpop.f32.mrf.mxu0 }
 0x116   :  { %v733_v48 = vadd.f32 %v1015_v45, %v693_v44  ;;  %v1017_v49 = vpop.f32.mrf.mxu1 }
 0x118   :  { %v738_v50 = vmax.f32 %v733_v48, 0.0 }
 0x11a   :  { %v739_v51 = vpack.c.bf16 %v738_v50, %v738_v50 }
 0x11c   :  { %1045 = vmatmul.mubr.bf16.vlgmr.msra.gmra.mxu0 %v739_v51 }
 0x1dc   :  { %v845_v53 = vpop.f32.mrf.mxu0 }
 0x1dd   :  { %v846_v54 = vadd.f32 %v922_v52, %v845_v53 }
 0x1de   :  { %v1046_v55 = vpop.f32.mrf.mxu0 }
 0x1df   :  { %851 = vst [vmem:[%s1239_s5] sm:$0xf] %v846_v54 }
 0x1e0   :  { %v848_v56 = vpop.f32.mrf.mxu0 }
 0x1e2   :  { %v1047_v57 = vpop.f32.mrf.mxu0 }
 0x1e3   :  { %856 = vsyncpa [#allocation3], 1 }

</bundles_post_ra>
